<compile_context>
chip_gen: v7x
topology: tpu7x:2x2x1
jax: 0.10.0
libtpu: 0.0.40
codegen_flags: <defaults>
</compile_context>

<pallas_src>
import functools
import math

import jax
import jax.numpy as jnp
from jax import lax
from jax.experimental import pallas as pl
from jax.experimental.pallas import tpu as pltpu

COMPLEXITY = 5   # initial_complexity -> functions 0..4: sin, cos, tanh, swish, squared_relu
NUM_FUNCS = 10
LN_EPS = 1e-5
LANE = 128


def _math_function(idx, t):
    """Mirror of self.mathematical_functions[function_names[idx]]."""
    if idx == 0:
        return jnp.sin(t)
    if idx == 1:
        return jnp.cos(t)
    if idx == 2:
        return jnp.tanh(t)
    if idx == 3:                                    # swish
        return jax.nn.sigmoid(t) * t
    if idx == 4:                                    # squared_relu
        return t * jnp.maximum(t, 0.0)
    if idx == 5:                                    # gaussian
        return jnp.exp(-t * t)
    if idx == 6:                                    # softplus
        return jnp.log(1.0 + jnp.exp(jnp.clip(t, -10.0, 10.0)))
    if idx == 7:                                    # softsign
        return t / (1.0 + jnp.abs(t))
    if idx == 8:                                    # sin_cos
        return jnp.sin(t) * jnp.cos(t)
    tc = jnp.clip(t, -5.0, 5.0)                     # hyperbolic
    return jnp.sinh(tc) / (1.0 + jnp.cosh(tc))


def expert_guided_kernel(x_ref, w_in_t_ref, b_in_ref, gamma_ref, beta_ref,
                         coeff_ref, expo_ref, phase_ref,
                         w_out_t_ref, b_out_ref, out_ref, *,
                         term_dtype=jnp.float32):
    xT = x_ref[...]                                            # (Din, TB) f32, batch on lanes

    # input_transform: h^T = W_in^T @ x^T + b_in                (I, TB)
    h = jnp.dot(w_in_t_ref[...], xT,
                preferred_element_type=jnp.float32) + b_in_ref[...]

    # layer_norm over the feature axis (sublane axis 0), biased var, then relu
    mean = jnp.mean(h, axis=0, keepdims=True)
    var = jnp.mean((h - mean) ** 2, axis=0, keepdims=True)
    h = (h - mean) * lax.rsqrt(var + LN_EPS)
    h = h * gamma_ref[...] + beta_ref[...]
    h = jnp.maximum(h, 0.0)

    # expert-guided adaptive equations (statically unrolled).
    # coeff is pre-scaled by function_importance_weights at param-prep time.
    coeff = coeff_ref[...]                                     # (I, C)
    expo = expo_ref[...]                                       # (I, C)
    phase = phase_ref[...]                                     # (I, C)

    if term_dtype != jnp.float32:                              # optional bf16 term stage (v6e/v7x)
        h = h.astype(term_dtype)
        coeff = coeff.astype(term_dtype)
        expo = expo.astype(term_dtype)
        phase = phase.astype(term_dtype)

    acc = None
    for i in range(COMPLEXITY):
        func_idx = i % NUM_FUNCS
        t = jnp.clip(h * expo[:, i:i + 1] + phase[:, i:i + 1], -10.0, 10.0)
        f = _math_function(func_idx, t)
        # nan_to_num omitted: every branch is finite for the clipped finite t.
        term = (coeff[:, i:i + 1] * f).astype(jnp.float32)     # accumulate in f32
        acc = term if acc is None else acc + term

    # output_transform + clamp: y^T = W_out^T @ acc + b_out     (Dout, TB)
    y = jnp.dot(w_out_t_ref[...], acc,
                preferred_element_type=jnp.float32) + b_out_ref[...]
    out_ref[...] = jnp.clip(y, -100.0, 100.0)


def _round_up(a, m):
    return ((a + m - 1) // m) * m


def expert_guided_forward_tn(xT, params, *, tb=32768, vmem_limit_bytes=None,
                             use_bf16_terms=False):
    """Performance interface: xT is (d_in, B), returns y^T with shape (d_out, B).

    Batch stays on the lane axis end to end; the wrapper adds NO HBM transpose
    or pad copies (ragged batches rely on Pallas' masked partial last block).
    """
    d_in, B = xT.shape
    internal_dim, d_in_w = params["w_in_t"].shape
    assert d_in_w == d_in
    d_out = params["w_out_t"].shape[0]

    # --- generation-aware scoped-VMEM limit (v5e/v6e: 128 MiB phys, v7x: 64 MiB) ---
    try:
        phys_vmem = int(getattr(pltpu.get_tpu_info(), "vmem_capacity_bytes",
                                64 * 1024 * 1024))
    except Exception:
        phys_vmem = 64 * 1024 * 1024
    if vmem_limit_bytes is None:
        # 64 MiB on 128-MiB parts, ~44 MiB on v7x (64 MiB physical).
        vmem_limit_bytes = min(64 << 20, (phys_vmem * 11) // 16)

    # Per-batch-column VMEM bytes: double-buffered x/out blocks plus in-kernel
    # elementwise intermediates (h, acc, t, f, term + slack), sublane-padded.
    rup8 = lambda n: _round_up(n, 8)
    per_col = 4 * (2 * rup8(d_in) + 2 * rup8(d_out) + 6 * rup8(internal_dim))
    fixed = 2 * 4 * (internal_dim * d_in + internal_dim * d_out
                     + 3 * internal_dim * COMPLEXITY + 3 * internal_dim + d_out)
    budget = (vmem_limit_bytes - fixed) * 3 // 4                # compiler headroom
    max_tb = max(LANE, (budget // per_col) // LANE * LANE)

    # Lane-dense batch tile: multiple of 128, never larger than the lane-rounded
    # batch, capped by the VMEM budget.
    B_lanes = _round_up(B, LANE)
    tb = max(LANE, min(_round_up(tb, LANE), max_tb, B_lanes))
    # Prefer >= 2 grid steps so ("parallel",) can split the batch across v7x's
    # two TensorCores (no-op on single-TC v5e/v6e).
    if B_lanes >= 2 * LANE and pl.cdiv(B_lanes, tb) < 2:
        tb = max(LANE, _round_up(pl.cdiv(B_lanes, 2), LANE))

    grid = (pl.cdiv(B, tb),)                                    # partial last block is masked

    term_dtype = jnp.bfloat16 if use_bf16_terms else jnp.float32
    whole = lambda i: (0, 0)

    cost = pl.CostEstimate(
        flops=B * (2 * d_in * internal_dim + 2 * internal_dim * d_out
                   + 8 * COMPLEXITY * internal_dim),
        transcendentals=B * 2 * COMPLEXITY * internal_dim,
        bytes_accessed=4 * B * (d_in + d_out) + fixed // 2,
    )

    yT = pl.pallas_call(
        functools.partial(expert_guided_kernel, term_dtype=term_dtype),
        out_shape=jax.ShapeDtypeStruct((d_out, B), jnp.float32),
        grid=grid,
        in_specs=[
            pl.BlockSpec((d_in, tb), lambda i: (0, i)),          # x^T block (lane-dense, contiguous rows)
            pl.BlockSpec((internal_dim, d_in), whole),           # W_in^T (torch layout)
            pl.BlockSpec((internal_dim, 1), whole),              # b_in
            pl.BlockSpec((internal_dim, 1), whole),              # ln gamma
            pl.BlockSpec((internal_dim, 1), whole),              # ln beta
            pl.BlockSpec((internal_dim, COMPLEXITY), whole),     # coeff * fw (pre-scaled)
            pl.BlockSpec((internal_dim, COMPLEXITY), whole),     # exponents
            pl.BlockSpec((internal_dim, COMPLEXITY), whole),     # phases
            pl.BlockSpec((d_out, internal_dim), whole),          # W_out^T (torch layout)
            pl.BlockSpec((d_out, 1), whole),                     # b_out
        ],
        out_specs=pl.BlockSpec((d_out, tb), lambda i: (0, i)),   # y^T, lane-dense store
        compiler_params=pltpu.CompilerParams(
            dimension_semantics=("parallel",),                   # megacore sharding on v7x
            vmem_limit_bytes=vmem_limit_bytes,
        ),
        cost_estimate=cost,
    )(xT, params["w_in_t"], params["b_in"], params["gamma"], params["beta"],
      params["coeff_scaled"], params["expo"], params["phase"],
      params["w_out_t"], params["b_out"])
    return yT


def expert_guided_forward(x, params, **kwargs):
    """Drop-in (B, d_in) -> (B, d_out) wrapper matching the PyTorch forward.

    NOTE: adds one transpose pair of HBM traffic around the kernel; for peak
    throughput produce x / consume y directly in (dim, batch) layout via
    expert_guided_forward_tn (XLA typically fuses those transposes into the
    adjacent producer/consumer ops).
    """
    return expert_guided_forward_tn(jnp.transpose(x), params, **kwargs).T


def init_params(key, input_dim, output_dim, complexity):
    """Deterministic synthetic init mirroring the module's __init__ shapes."""
    internal_dim = max(output_dim, complexity, input_dim // 2 + 1)
    k = jax.random.split(key, 5)
    # xavier_uniform_(gain=0.5) on torch Linear weight (out, in)
    a_in = 0.5 * math.sqrt(6.0 / (input_dim + internal_dim))
    w_in_t = jax.random.uniform(k[0], (internal_dim, input_dim), jnp.float32, -a_in, a_in)
    a_out = 0.5 * math.sqrt(6.0 / (internal_dim + output_dim))
    w_out_t = jax.random.uniform(k[1], (output_dim, internal_dim), jnp.float32, -a_out, a_out)
    coeff = jax.random.normal(k[2], (internal_dim, complexity), jnp.float32) * 0.05
    expo = jax.random.uniform(k[3], (internal_dim, complexity), jnp.float32) * 1.5 + 0.25
    phase = jax.random.uniform(k[4], (internal_dim, complexity), jnp.float32) * 2.0 * math.pi
    fw = jnp.ones((NUM_FUNCS,), jnp.float32) / NUM_FUNCS
    term_fw = fw[jnp.arange(complexity) % NUM_FUNCS]            # (C,)
    return dict(
        w_in_t=w_in_t,
        b_in=jnp.zeros((internal_dim, 1), jnp.float32),
        gamma=jnp.ones((internal_dim, 1), jnp.float32),
        beta=jnp.zeros((internal_dim, 1), jnp.float32),
        coeff=coeff,
        coeff_scaled=coeff * term_fw[None, :],                  # fold fw into coeff
        expo=expo,
        phase=phase,
        fw=fw,
        w_out_t=w_out_t,
        b_out=jnp.zeros((output_dim, 1), jnp.float32),
    )


def reference_forward(x, params):
    """Pure-JAX reference matching the PyTorch forward (batch-major layout)."""
    h = x @ params["w_in_t"].T + params["b_in"].T
    mean = jnp.mean(h, axis=-1, keepdims=True)
    var = jnp.mean((h - mean) ** 2, axis=-1, keepdims=True)
    h = (h - mean) / jnp.sqrt(var + LN_EPS) * params["gamma"].T + params["beta"].T
    h = jnp.maximum(h, 0.0)
    acc = jnp.zeros_like(h)
    for i in range(COMPLEXITY):
        idx = i % NUM_FUNCS
        t = jnp.clip(h * params["expo"][:, i][None, :] + params["phase"][:, i][None, :],
                     -10.0, 10.0)
        f = jnp.nan_to_num(_math_function(idx, t), nan=0.0, posinf=10000.0, neginf=-10000.0)
        acc = acc + params["coeff"][:, i][None, :] * f * params["fw"][idx]
    y = acc @ params["w_out_t"].T + params["b_out"].T
    return jnp.clip(y, -100.0, 100.0)


if __name__ == "__main__":
    input_dim, output_dim, batch = 16, 8, 160   # batch not a multiple of 128 -> exercises partial block
    key = jax.random.PRNGKey(0)
    pkey, xkey = jax.random.split(key)
    params = init_params(pkey, input_dim, output_dim, COMPLEXITY)

    # Performance interface: x produced directly in (d_in, B) layout so the
    # forward path has zero wrapper-side HBM transposes or pad copies.
    xT = jax.random.normal(xkey, (input_dim, batch), jnp.float32)

    outT = jax.block_until_ready(expert_guided_forward_tn(xT, params))
    assert outT.shape == (output_dim, batch)

    ref = reference_forward(xT.T, params)                       # batch-major reference
    assert jnp.allclose(outT.T, ref, atol=5e-3, rtol=5e-3), "mismatch vs reference (tn path)"

    # Drop-in batch-major wrapper (parity with the PyTorch interface).
    out_bm = jax.block_until_ready(expert_guided_forward(xT.T, params))
    assert out_bm.shape == (batch, output_dim)
    assert jnp.allclose(out_bm, ref, atol=5e-3, rtol=5e-3), "mismatch vs reference (bm path)"

    print("KERNEL_OK")
</pallas_src>

<mosaic_0001>
module attributes {stable_mosaic.version = 11 : i64} {
  func.func @expert_guided_kernel(%arg0: i32, %arg1: memref<16x128xf32, #tpu.memory_space<vmem>>, %arg2: memref<9x16xf32, #tpu.memory_space<vmem>>, %arg3: memref<9x1xf32, #tpu.memory_space<vmem>>, %arg4: memref<9x1xf32, #tpu.memory_space<vmem>>, %arg5: memref<9x1xf32, #tpu.memory_space<vmem>>, %arg6: memref<9x5xf32, #tpu.memory_space<vmem>>, %arg7: memref<9x5xf32, #tpu.memory_space<vmem>>, %arg8: memref<9x5xf32, #tpu.memory_space<vmem>>, %arg9: memref<8x9xf32, #tpu.memory_space<vmem>>, %arg10: memref<8x1xf32, #tpu.memory_space<vmem>>, %arg11: memref<8x128xf32, #tpu.memory_space<vmem>>) attributes {dimension_semantics = [#tpu.dimension_semantics<parallel>], iteration_bounds = array<i64: 2>, scalar_prefetch = 0 : i64, scratch_operands = 0 : i64, tpu.core_type = #tpu.core_type<tc>, window_params = [{transform_indices = @transform_0, window_bounds = array<i64: 16, 128>}, {pipeline_mode = #tpu.pipeline_mode<synchronous>, transform_indices = @transform_1, window_bounds = array<i64: 9, 16>}, {pipeline_mode = #tpu.pipeline_mode<synchronous>, transform_indices = @transform_2, window_bounds = array<i64: 9, 1>}, {pipeline_mode = #tpu.pipeline_mode<synchronous>, transform_indices = @transform_3, window_bounds = array<i64: 9, 1>}, {pipeline_mode = #tpu.pipeline_mode<synchronous>, transform_indices = @transform_4, window_bounds = array<i64: 9, 1>}, {pipeline_mode = #tpu.pipeline_mode<synchronous>, transform_indices = @transform_5, window_bounds = array<i64: 9, 5>}, {pipeline_mode = #tpu.pipeline_mode<synchronous>, transform_indices = @transform_6, window_bounds = array<i64: 9, 5>}, {pipeline_mode = #tpu.pipeline_mode<synchronous>, transform_indices = @transform_7, window_bounds = array<i64: 9, 5>}, {pipeline_mode = #tpu.pipeline_mode<synchronous>, transform_indices = @transform_8, window_bounds = array<i64: 8, 9>}, {pipeline_mode = #tpu.pipeline_mode<synchronous>, transform_indices = @transform_9, window_bounds = array<i64: 8, 1>}, {transform_indices = @transform_10, window_bounds = array<i64: 8, 128>}]} {
    %c0 = arith.constant 0 : index
    %c0_0 = arith.constant 0 : index
    %0 = vector.load %arg1[%c0, %c0_0] : memref<16x128xf32, #tpu.memory_space<vmem>>, vector<16x128xf32>
    %c0_1 = arith.constant 0 : index
    %c0_2 = arith.constant 0 : index
    %1 = vector.load %arg2[%c0_1, %c0_2] : memref<9x16xf32, #tpu.memory_space<vmem>>, vector<9x16xf32>
    %cst = arith.constant dense<0.000000e+00> : vector<9x128xf32>
    %2 = tpu.matmul %1, %0, %cst {dimension_numbers = #tpu.dot_dimension_numbers<[1], [0], [0], [1], [0, 0, 1, 1], [], []>} : vector<9x16xf32>, vector<16x128xf32>, vector<9x128xf32> -> vector<9x128xf32>
    %c0_3 = arith.constant 0 : index
    %c0_4 = arith.constant 0 : index
    %3 = vector.load %arg3[%c0_3, %c0_4] : memref<9x1xf32, #tpu.memory_space<vmem>>, vector<9x1xf32>
    %4 = vector.broadcast %3 : vector<9x1xf32> to vector<9x128xf32>
    %5 = arith.addf %2, %4 : vector<9x128xf32>
    %cst_5 = arith.constant dense<0.000000e+00> : vector<128xf32>
    %6 = vector.multi_reduction <add>, %5, %cst_5 [0] : vector<9x128xf32> to vector<128xf32>
    %7 = vector.shape_cast %6 : vector<128xf32> to vector<1x128xf32>
    %cst_6 = arith.constant 9.000000e+00 : f32
    %8 = vector.broadcast %cst_6 : f32 to vector<1x128xf32>
    %9 = arith.divf %7, %8 : vector<1x128xf32>
    %10 = vector.broadcast %9 : vector<1x128xf32> to vector<9x128xf32>
    %11 = arith.subf %5, %10 : vector<9x128xf32>
    %12 = arith.mulf %11, %11 : vector<9x128xf32>
    %cst_7 = arith.constant dense<0.000000e+00> : vector<128xf32>
    %13 = vector.multi_reduction <add>, %12, %cst_7 [0] : vector<9x128xf32> to vector<128xf32>
    %14 = vector.shape_cast %13 : vector<128xf32> to vector<1x128xf32>
    %cst_8 = arith.constant 9.000000e+00 : f32
    %15 = vector.broadcast %cst_8 : f32 to vector<1x128xf32>
    %16 = arith.divf %14, %15 : vector<1x128xf32>
    %17 = vector.broadcast %9 : vector<1x128xf32> to vector<9x128xf32>
    %18 = arith.subf %5, %17 : vector<9x128xf32>
    %cst_9 = arith.constant 9.99999974E-6 : f32
    %19 = vector.broadcast %cst_9 : f32 to vector<1x128xf32>
    %20 = arith.addf %16, %19 : vector<1x128xf32>
    %21 = math.rsqrt %20 : vector<1x128xf32>
    %22 = vector.broadcast %21 : vector<1x128xf32> to vector<9x128xf32>
    %23 = arith.mulf %18, %22 : vector<9x128xf32>
    %c0_10 = arith.constant 0 : index
    %c0_11 = arith.constant 0 : index
    %24 = vector.load %arg4[%c0_10, %c0_11] : memref<9x1xf32, #tpu.memory_space<vmem>>, vector<9x1xf32>
    %25 = vector.broadcast %24 : vector<9x1xf32> to vector<9x128xf32>
    %26 = arith.mulf %23, %25 : vector<9x128xf32>
    %c0_12 = arith.constant 0 : index
    %c0_13 = arith.constant 0 : index
    %27 = vector.load %arg5[%c0_12, %c0_13] : memref<9x1xf32, #tpu.memory_space<vmem>>, vector<9x1xf32>
    %28 = vector.broadcast %27 : vector<9x1xf32> to vector<9x128xf32>
    %29 = arith.addf %26, %28 : vector<9x128xf32>
    %cst_14 = arith.constant 0.000000e+00 : f32
    %30 = vector.broadcast %cst_14 : f32 to vector<9x128xf32>
    %31 = arith.maximumf %29, %30 : vector<9x128xf32>
    %c0_15 = arith.constant 0 : index
    %c0_16 = arith.constant 0 : index
    %32 = vector.load %arg6[%c0_15, %c0_16] : memref<9x5xf32, #tpu.memory_space<vmem>>, vector<9x5xf32>
    %c0_17 = arith.constant 0 : index
    %c0_18 = arith.constant 0 : index
    %33 = vector.load %arg7[%c0_17, %c0_18] : memref<9x5xf32, #tpu.memory_space<vmem>>, vector<9x5xf32>
    %c0_19 = arith.constant 0 : index
    %c0_20 = arith.constant 0 : index
    %34 = vector.load %arg8[%c0_19, %c0_20] : memref<9x5xf32, #tpu.memory_space<vmem>>, vector<9x5xf32>
    %35 = vector.extract_strided_slice %33 {offsets = [0, 0], sizes = [9, 1], strides = [1, 1]} : vector<9x5xf32> to vector<9x1xf32>
    %36 = vector.broadcast %35 : vector<9x1xf32> to vector<9x128xf32>
    %37 = arith.mulf %31, %36 : vector<9x128xf32>
    %38 = vector.extract_strided_slice %34 {offsets = [0, 0], sizes = [9, 1], strides = [1, 1]} : vector<9x5xf32> to vector<9x1xf32>
    %39 = vector.broadcast %38 : vector<9x1xf32> to vector<9x128xf32>
    %40 = arith.addf %37, %39 : vector<9x128xf32>
    %cst_21 = arith.constant -1.000000e+01 : f32
    %cst_22 = arith.constant 1.000000e+01 : f32
    %41 = vector.broadcast %cst_21 : f32 to vector<9x128xf32>
    %42 = arith.maximumf %41, %40 : vector<9x128xf32>
    %43 = vector.broadcast %cst_22 : f32 to vector<9x128xf32>
    %44 = arith.minimumf %43, %42 : vector<9x128xf32>
    %45 = math.sin %44 : vector<9x128xf32>
    %46 = vector.extract_strided_slice %32 {offsets = [0, 0], sizes = [9, 1], strides = [1, 1]} : vector<9x5xf32> to vector<9x1xf32>
    %47 = vector.broadcast %46 : vector<9x1xf32> to vector<9x128xf32>
    %48 = arith.mulf %47, %45 : vector<9x128xf32>
    %49 = vector.extract_strided_slice %33 {offsets = [0, 1], sizes = [9, 1], strides = [1, 1]} : vector<9x5xf32> to vector<9x1xf32>
    %50 = vector.broadcast %49 : vector<9x1xf32> to vector<9x128xf32>
    %51 = arith.mulf %31, %50 : vector<9x128xf32>
    %52 = vector.extract_strided_slice %34 {offsets = [0, 1], sizes = [9, 1], strides = [1, 1]} : vector<9x5xf32> to vector<9x1xf32>
    %53 = vector.broadcast %52 : vector<9x1xf32> to vector<9x128xf32>
    %54 = arith.addf %51, %53 : vector<9x128xf32>
    %cst_23 = arith.constant -1.000000e+01 : f32
    %cst_24 = arith.constant 1.000000e+01 : f32
    %55 = vector.broadcast %cst_23 : f32 to vector<9x128xf32>
    %56 = arith.maximumf %55, %54 : vector<9x128xf32>
    %57 = vector.broadcast %cst_24 : f32 to vector<9x128xf32>
    %58 = arith.minimumf %57, %56 : vector<9x128xf32>
    %59 = math.cos %58 : vector<9x128xf32>
    %60 = vector.extract_strided_slice %32 {offsets = [0, 1], sizes = [9, 1], strides = [1, 1]} : vector<9x5xf32> to vector<9x1xf32>
    %61 = vector.broadcast %60 : vector<9x1xf32> to vector<9x128xf32>
    %62 = arith.mulf %61, %59 : vector<9x128xf32>
    %63 = arith.addf %48, %62 : vector<9x128xf32>
    %64 = vector.extract_strided_slice %33 {offsets = [0, 2], sizes = [9, 1], strides = [1, 1]} : vector<9x5xf32> to vector<9x1xf32>
    %65 = vector.broadcast %64 : vector<9x1xf32> to vector<9x128xf32>
    %66 = arith.mulf %31, %65 : vector<9x128xf32>
    %67 = vector.extract_strided_slice %34 {offsets = [0, 2], sizes = [9, 1], strides = [1, 1]} : vector<9x5xf32> to vector<9x1xf32>
    %68 = vector.broadcast %67 : vector<9x1xf32> to vector<9x128xf32>
    %69 = arith.addf %66, %68 : vector<9x128xf32>
    %cst_25 = arith.constant -1.000000e+01 : f32
    %cst_26 = arith.constant 1.000000e+01 : f32
    %70 = vector.broadcast %cst_25 : f32 to vector<9x128xf32>
    %71 = arith.maximumf %70, %69 : vector<9x128xf32>
    %72 = vector.broadcast %cst_26 : f32 to vector<9x128xf32>
    %73 = arith.minimumf %72, %71 : vector<9x128xf32>
    %74 = math.tanh %73 : vector<9x128xf32>
    %75 = vector.extract_strided_slice %32 {offsets = [0, 2], sizes = [9, 1], strides = [1, 1]} : vector<9x5xf32> to vector<9x1xf32>
    %76 = vector.broadcast %75 : vector<9x1xf32> to vector<9x128xf32>
    %77 = arith.mulf %76, %74 : vector<9x128xf32>
    %78 = arith.addf %63, %77 : vector<9x128xf32>
    %79 = vector.extract_strided_slice %33 {offsets = [0, 3], sizes = [9, 1], strides = [1, 1]} : vector<9x5xf32> to vector<9x1xf32>
    %80 = vector.broadcast %79 : vector<9x1xf32> to vector<9x128xf32>
    %81 = arith.mulf %31, %80 : vector<9x128xf32>
    %82 = vector.extract_strided_slice %34 {offsets = [0, 3], sizes = [9, 1], strides = [1, 1]} : vector<9x5xf32> to vector<9x1xf32>
    %83 = vector.broadcast %82 : vector<9x1xf32> to vector<9x128xf32>
    %84 = arith.addf %81, %83 : vector<9x128xf32>
    %cst_27 = arith.constant -1.000000e+01 : f32
    %cst_28 = arith.constant 1.000000e+01 : f32
    %85 = vector.broadcast %cst_27 : f32 to vector<9x128xf32>
    %86 = arith.maximumf %85, %84 : vector<9x128xf32>
    %87 = vector.broadcast %cst_28 : f32 to vector<9x128xf32>
    %88 = arith.minimumf %87, %86 : vector<9x128xf32>
    %89 = arith.negf %88 : vector<9x128xf32>
    %90 = math.exp %89 : vector<9x128xf32>
    %cst_29 = arith.constant 1.000000e+00 : f32
    %91 = vector.broadcast %cst_29 : f32 to vector<9x128xf32>
    %92 = arith.addf %91, %90 : vector<9x128xf32>
    %93 = arith.divf %91, %92 : vector<9x128xf32>
    %94 = arith.mulf %93, %88 : vector<9x128xf32>
    %95 = vector.extract_strided_slice %32 {offsets = [0, 3], sizes = [9, 1], strides = [1, 1]} : vector<9x5xf32> to vector<9x1xf32>
    %96 = vector.broadcast %95 : vector<9x1xf32> to vector<9x128xf32>
    %97 = arith.mulf %96, %94 : vector<9x128xf32>
    %98 = arith.addf %78, %97 : vector<9x128xf32>
    %99 = vector.extract_strided_slice %33 {offsets = [0, 4], sizes = [9, 1], strides = [1, 1]} : vector<9x5xf32> to vector<9x1xf32>
    %100 = vector.broadcast %99 : vector<9x1xf32> to vector<9x128xf32>
    %101 = arith.mulf %31, %100 : vector<9x128xf32>
    %102 = vector.extract_strided_slice %34 {offsets = [0, 4], sizes = [9, 1], strides = [1, 1]} : vector<9x5xf32> to vector<9x1xf32>
    %103 = vector.broadcast %102 : vector<9x1xf32> to vector<9x128xf32>
    %104 = arith.addf %101, %103 : vector<9x128xf32>
    %cst_30 = arith.constant -1.000000e+01 : f32
    %cst_31 = arith.constant 1.000000e+01 : f32
    %105 = vector.broadcast %cst_30 : f32 to vector<9x128xf32>
    %106 = arith.maximumf %105, %104 : vector<9x128xf32>
    %107 = vector.broadcast %cst_31 : f32 to vector<9x128xf32>
    %108 = arith.minimumf %107, %106 : vector<9x128xf32>
    %cst_32 = arith.constant 0.000000e+00 : f32
    %109 = vector.broadcast %cst_32 : f32 to vector<9x128xf32>
    %110 = arith.maximumf %108, %109 : vector<9x128xf32>
    %111 = arith.mulf %108, %110 : vector<9x128xf32>
    %112 = vector.extract_strided_slice %32 {offsets = [0, 4], sizes = [9, 1], strides = [1, 1]} : vector<9x5xf32> to vector<9x1xf32>
    %113 = vector.broadcast %112 : vector<9x1xf32> to vector<9x128xf32>
    %114 = arith.mulf %113, %111 : vector<9x128xf32>
    %115 = arith.addf %98, %114 : vector<9x128xf32>
    %c0_33 = arith.constant 0 : index
    %c0_34 = arith.constant 0 : index
    %116 = vector.load %arg9[%c0_33, %c0_34] : memref<8x9xf32, #tpu.memory_space<vmem>>, vector<8x9xf32>
    %cst_35 = arith.constant dense<0.000000e+00> : vector<8x128xf32>
    %117 = tpu.matmul %116, %115, %cst_35 {dimension_numbers = #tpu.dot_dimension_numbers<[1], [0], [0], [1], [0, 0, 1, 1], [], []>} : vector<8x9xf32>, vector<9x128xf32>, vector<8x128xf32> -> vector<8x128xf32>
    %c0_36 = arith.constant 0 : index
    %c0_37 = arith.constant 0 : index
    %118 = vector.load %arg10[%c0_36, %c0_37] : memref<8x1xf32, #tpu.memory_space<vmem>>, vector<8x1xf32>
    %119 = vector.broadcast %118 : vector<8x1xf32> to vector<8x128xf32>
    %120 = arith.addf %117, %119 : vector<8x128xf32>
    %cst_38 = arith.constant -1.000000e+02 : f32
    %cst_39 = arith.constant 1.000000e+02 : f32
    %121 = vector.broadcast %cst_38 : f32 to vector<8x128xf32>
    %122 = arith.maximumf %121, %120 : vector<8x128xf32>
    %123 = vector.broadcast %cst_39 : f32 to vector<8x128xf32>
    %124 = arith.minimumf %123, %122 : vector<8x128xf32>
    %c0_40 = arith.constant 0 : index
    %c0_41 = arith.constant 0 : index
    %125 = vector.load %arg11[%c0_40, %c0_41] : memref<8x128xf32, #tpu.memory_space<vmem>>, vector<8x128xf32>
    tpu.vector_store %arg11[%c0_40, %c0_41], %124 {strides = array<i32>} : memref<8x128xf32, #tpu.memory_space<vmem>>, vector<8x128xf32>,
    return
  }
  func.func @transform_0(%arg0: i32) -> (i32, i32) {
    %c0_i32 = arith.constant 0 : i32
    %c0_i32_0 = arith.constant 0 : i32
    return %c0_i32, %arg0 : i32, i32
  }
  func.func @transform_1(%arg0: i32) -> (i32, i32) {
    %c0_i32 = arith.constant 0 : i32
    %c0_i32_0 = arith.constant 0 : i32
    %c0_i32_1 = arith.constant 0 : i32
    return %c0_i32, %c0_i32_0 : i32, i32
  }
  func.func @transform_2(%arg0: i32) -> (i32, i32) {
    %c0_i32 = arith.constant 0 : i32
    %c0_i32_0 = arith.constant 0 : i32
    %c0_i32_1 = arith.constant 0 : i32
    return %c0_i32, %c0_i32_0 : i32, i32
  }
  func.func @transform_3(%arg0: i32) -> (i32, i32) {
    %c0_i32 = arith.constant 0 : i32
    %c0_i32_0 = arith.constant 0 : i32
    %c0_i32_1 = arith.constant 0 : i32
    return %c0_i32, %c0_i32_0 : i32, i32
  }
  func.func @transform_4(%arg0: i32) -> (i32, i32) {
    %c0_i32 = arith.constant 0 : i32
    %c0_i32_0 = arith.constant 0 : i32
    %c0_i32_1 = arith.constant 0 : i32
    return %c0_i32, %c0_i32_0 : i32, i32
  }
  func.func @transform_5(%arg0: i32) -> (i32, i32) {
    %c0_i32 = arith.constant 0 : i32
    %c0_i32_0 = arith.constant 0 : i32
    %c0_i32_1 = arith.constant 0 : i32
    return %c0_i32, %c0_i32_0 : i32, i32
  }
  func.func @transform_6(%arg0: i32) -> (i32, i32) {
    %c0_i32 = arith.constant 0 : i32
    %c0_i32_0 = arith.constant 0 : i32
    %c0_i32_1 = arith.constant 0 : i32
    return %c0_i32, %c0_i32_0 : i32, i32
  }
  func.func @transform_7(%arg0: i32) -> (i32, i32) {
    %c0_i32 = arith.constant 0 : i32
    %c0_i32_0 = arith.constant 0 : i32
    %c0_i32_1 = arith.constant 0 : i32
    return %c0_i32, %c0_i32_0 : i32, i32
  }
  func.func @transform_8(%arg0: i32) -> (i32, i32) {
    %c0_i32 = arith.constant 0 : i32
    %c0_i32_0 = arith.constant 0 : i32
    %c0_i32_1 = arith.constant 0 : i32
    return %c0_i32, %c0_i32_0 : i32, i32
  }
  func.func @transform_9(%arg0: i32) -> (i32, i32) {
    %c0_i32 = arith.constant 0 : i32
    %c0_i32_0 = arith.constant 0 : i32
    %c0_i32_1 = arith.constant 0 : i32
    return %c0_i32, %c0_i32_0 : i32, i32
  }
  func.func @transform_10(%arg0: i32) -> (i32, i32) {
    %c0_i32 = arith.constant 0 : i32
    %c0_i32_0 = arith.constant 0 : i32
    return %c0_i32, %arg0 : i32, i32
  }
}

</mosaic_0001>

<bundles_post_ra>
// kernel: tpu_custom_call.1
= control target key start
LH: loop header
LB: loop body
LE: loop exit
PB: predicated region body
PF: predicated region fallthrough
CT: control target
= control target key end

     0   :  { %15 = vsyncpa [#allocation4], 0  ;;  %s2262_s0 = inlined_call_operand.vmem [shape: f32[16,160], index: 0, kind: input, shape index: {}]   ;;  %s2263_s1 = inlined_call_operand.vmem [shape: f32[9,16], index: 1, kind: input, shape index: {}]   ;;  %s2264_s2 = inlined_call_operand.vmem [shape: f32[9,1], index: 2, kind: input, shape index: {}]   ;;  %s2265_s3 = inlined_call_operand.vmem [shape: f32[9,1], index: 3, kind: input, shape index: {}]   ;;  %s2266_s4 = inlined_call_operand.vmem [shape: f32[9,1], index: 4, kind: input, shape index: {}]   ;;  %s2267_s5 = inlined_call_operand.vmem [shape: f32[9,5], index: 5, kind: input, shape index: {}]   ;;  %s2268_s6 = inlined_call_operand.vmem [shape: f32[9,5], index: 6, kind: input, shape index: {}]   ;;  %s2269_s7 = inlined_call_operand.vmem [shape: f32[9,5], index: 7, kind: input, shape index: {}]   ;;  %s2270_s8 = inlined_call_operand.vmem [shape: f32[8,9], index: 8, kind: input, shape index: {}]   ;;  %s2271_s9 = inlined_call_operand.vmem [shape: f32[8,1], index: 9, kind: input, shape index: {}]   ;;  %s2272_s10 = inlined_call_operand.hbm [shape: f32[8,160], index: 10, kind: output, shape index: {}]  }
   0x1   :  { %17 = vsyncpa [#allocation4 + $0x1], 0  ;;  %s1673_s13 = smov 0   ;;  %s1675_s14 = smov 0  }
   0x2   :  { %s1677_s15 = smov 0   ;;  %s1679_s16 = smov 0  }
   0x3 LB: > { %s1341_s17 = sadd.s32 4294967295, %s1600_s16   ;;  %s1342_s18 = sadd.s32 4294967294, %s1600_s16   ;;  %s1600_s16 = sphi %s1679_s16, %s2284_s16   ;;  %s1596_s15 = sphi %s1677_s15, %s2283_s15   ;;  %s1592_s14 = sphi %s1675_s14, %s2282_s14   ;;  %s1588_s13 = sphi %s1673_s13, %s2281_s13  }
   0x4   : > { %s1696_s19 = sadd.s32 1, %s1600_s16   ;;  %s30_s20 = sadd.s32 1, %s1596_s15 }
   0x5   : > { %s27_s21 = ssub.s32 %s1600_s16, %s1696_s19  ;;  %p37_p0 = scmp.ne.s32.totalorder %s1596_s15, %s1592_s14 }
   0x6   : > { %p28_p1 = scmp.eq.s32.totalorder %s27_s21, 0  ;;  %p38_p2 = scmp.eq.s32.totalorder %s1600_s16, 0 }
   0x7   : > { %p256_p3 = scmp.eq.s32.totalorder %s1341_s17, 1  ;;  %p261_p4 = scmp.ne.s32.totalorder %s1592_s14, %s1588_s13 }
   0x8   : > { %s1709_s22 = scalar_select %p28_p1, %s1596_s15, %s30_s20  }
   0x9   : > { %p39_p5 = por %p38_p2, %p37_p0  ;;  %p1711_p6 = por %p256_p3, %p37_p0 }
   0xa   : > { %p262_p7 = scmp.eq.s32.totalorder %s1342_s18, 1  ;;  %p1344_p9 = scmp.ge.s32.totalorder %s1600_s16, 2 }
   0xc   : > { %p1715_p8 = por %p262_p7, %p261_p4  ;;  %305 = sbr.rel (%p1344_p9) target bundleno = 26 (0x1a), region = 52 }
  0x13   : > { %308 = sbr.rel (!%p39_p5) target bundleno = 26 (0x1a), region = 56  ;;  %s310_s25 = sand.u32 (%p39_p5), 1, %s1596_s15  }
  0x14   : > { %s1346_s26 = sshll.u32 (%p39_p5), %s1600_s16, 3  ;;  %s1345_s27 = sshll.u32 (%p39_p5), %s310_s25, 4 }
  0x15   : > { %s314_s30 = scalar_lea.vmem (%p39_p5), %s2262_s0, %s1346_s26  ;;  %s312_s11 = scalar_lea.vmem (%p39_p5), [#allocation2], %s1345_s27 }
  0x16   : > { %v344_v0 = vld [vmem:[%s314_s30] sm:$0xff] (%p39_p5)  ;;  %v346_v1 = vld [vmem:[%s314_s30 + $0x10] sm:$0xff] (%p39_p5) }
  0x17   : > { %345 = vst [vmem:[%s312_s11] sm:$0xff] (%p39_p5), %v344_v0  ;;  %347 = vst [vmem:[%s312_s11 + $0x8] sm:$0xff] (%p39_p5), %v346_v1 }
  0x1a PF: > { %p1347_p10 = scmp.ge.s32.totalorder %s1600_s16, 1  ;;  %p352_p11 = scmp.lt.s32.totalorder %s1600_s16, 3 }
  0x1c   : > { %p353_p12 = pnand %p1347_p10, %p352_p11 }
  0x1d   : > { %s1730_s12 = sand.u32 (!%p353_p12), 1, %s1592_s14   ;;  %v398_v2 = vld [vmem:[%s2263_s1] sm:$0xff] (!%p353_p12)  ;;  %vm412_vm0 = vcmask (!%p353_p12), 130048   ;;  %v1602_v3 = vmov (!%p353_p12), 0   ;;  %v401_v5 = vld [vmem:[%s2264_s2 + $0x8] sm:$0x1] (!%p353_p12) }
  0x1e   : > { %356 = sbr.rel (%p353_p12) target bundleno = 699 (0x2bb), region = 94  ;;  %s1348_s21 = sshll.u32 (!%p353_p12), %s1730_s12, 4  ;;  %1398 = vmatprep.mubr.msk.f32.mxu0 (!%p353_p12), %vm412_vm0, %v398_v2  ;;  %1487 = vset.pattern.permute.xlu1 (!%p353_p12), %v1602_v3  ;;  %v522_v4 = vld [vmem:[%s2265_s3] sm:$0xff] (!%p353_p12)  ;;  %v523_v8 = vld [vmem:[%s2265_s3 + $0x8] sm:$0x1] (!%p353_p12)  ;;  %v1603_v15 = vmov (!%p353_p12), 1  }
  0x1f   : > { %526 = vperm.xlu1 (!%p353_p12), %1487, %v522_v4   ;;  %1486 = vset.pattern.permute.xlu0 (!%p353_p12), %v1602_v3  ;;  %s361_s29 = scalar_lea.vmem (!%p353_p12), [#allocation2], %s1348_s21  ;;  %v400_v10 = vld [vmem:[%s2264_s2] sm:$0xff] (!%p353_p12)  ;;  %v399_v11 = vld [vmem:[%s2263_s1 + $0x8] sm:$0x1] (!%p353_p12)  ;;  %v1604_v19 = vmov (!%p353_p12), 3   ;;  %v1605_v20 = vmov (!%p353_p12), 2  }
  0x20   : > { %v396_v6 = vld [vmem:[%s361_s29] sm:$0xff] (!%p353_p12)  ;;  %v397_v7 = vld [vmem:[%s361_s29 + $0x8] sm:$0xff] (!%p353_p12)  ;;  %409 = vperm.xlu0 (!%p353_p12), %1486, %v401_v5   ;;  %v1606_v21 = vmov (!%p353_p12), 4   ;;  %vm494_vm1 = vcmask (!%p353_p12), 1040384   ;;  %s1349_s21 = sshll.u32 (!%p353_p12), %s1730_s12, 3  ;;  %s1384_s27 = sshll.u32 (!%p353_p12), %s1341_s17, 7 }
  0x21   : > { %v1408_v9 = vpack.c.bf16 (!%p353_p12), %v397_v7, %v396_v6  ;;  %v537_v12 = vld [vmem:[%s2266_s4 + $0x8] sm:$0x1] (!%p353_p12)  ;;  %v554_v14 = vld [vmem:[%s2268_s6] sm:$0xff] (!%p353_p12)  ;;  %s395_s28 = scalar_lea.vmem (!%p353_p12), [#allocation3], %s1349_s21  ;;  %s2218_s18 = scalar_lea.hbm (!%p353_p12), %s2272_s10, %s1384_s27 }
  0x22   : > { %v555_v13 = vld [vmem:[%s2268_s6 + $0x8] sm:$0x1] (!%p353_p12)  ;;  %v536_v16 = vld [vmem:[%s2266_s4] sm:$0xff] (!%p353_p12)  ;;  %s1277_s29 = sshll.u32 (!%p353_p12), %s395_s28, 4  ;;  %s1264_s20 = scalar_lea.sflag (!%p353_p12), [#allocation4], %s1730_s12  ;;  %s2220_s29 = int_to_ptr.vmem [resolvable:$true] %s1277_s29 }
  0x23   : > { %1409 = vmatprep.subr.bf16.mxu0 (!%p353_p12), %v1408_v9  ;;  %531 = vperm.xlu1 (!%p353_p12), %1487, %v523_v8   ;;  %v556_v17 = vld [vmem:[%s2269_s7] sm:$0xff] (!%p353_p12)  ;;  %v557_v18 = vld [vmem:[%s2269_s7 + $0x8] sm:$0x1] (!%p353_p12)  ;;  %s1538_s25 = scalar_lea.vmem (!%p353_p12), %s2220_s29, 128  ;;  %s1617_s17 = smov (!%p353_p12), [#allocation3]  }
  0x24   : > { %1411 = vmatpush3.bf16.msra.mxu0 (!%p353_p12), %v1408_v9  ;;  %404 = vperm.xlu0 (!%p353_p12), %1486, %v400_v10   ;;  %v553_v22 = vld [vmem:[%s2267_s5 + $0x8] sm:$0x1] (!%p353_p12)  ;;  %v552_v23 = vld [vmem:[%s2267_s5] sm:$0xff] (!%p353_p12)  ;;  %p1539_p13 = scmp.ne.s32.totalorder (!%p353_p12), %s2220_s29, %s1538_s25  ;;  %s1542_s26 = sshll.u32 (!%p353_p12), %s1617_s17, 4  ;;  %s1543_s26 = int_to_ptr.vmem [resolvable:$false] %s1542_s26 }
  0x25   : > { %s1544_s21 = scalar_lea.vmem %s1543_s26, 256  ;;  %p1545_p2 = scmp.lt.s32.totalorder %s2220_s29, %s1543_s26 }
  0x26   : > { %p1540_p0 = pnand %p1539_p13, %p1711_p6  ;;  %p1546_p3 = scmp.lt.s32.totalorder %s1544_s21, %s1538_s25 }
  0x27   : > { %1399 = vmatmul.mubr.msk.f32.vlgmr.msra.gmra.mrb[0].mxu0 %vm412_vm0, %v399_v11  ;;  %545 = vperm.xlu1 %1487, %v537_v12  }
  0x28   : > { %1488 = vset.pattern.permute.xlu0 %v1603_v15  ;;  %p1541_p1 = pneg %p1540_p0  ;;  %p1547_p4 = por %p1546_p3, %p1545_p2 }
  0x29   : > { %807 = vperm.xlu0 %1488, %v554_v14  }
  0x2a   : > { %p1548_p5 = pnand %p1547_p4, %p1541_p1 }
  0x2b   : > { %565 = vperm.xlu1 %1487, %v555_v13  }
  0x2d   : > { %1489 = vset.pattern.permute.xlu0 %v1602_v3 }
  0x2e   : > { %540 = vperm.xlu0 %1489, %v536_v16  }
  0x2f   : > { %1490 = vset.pattern.permute.xlu1 %v1603_v15 }
  0x30   : > { %811 = vperm.xlu1 %1490, %v555_v13  }
  0x32   : > { %560 = vperm.xlu0 %1489, %v554_v14  }
  0x34   : > { %1491 = vset.pattern.permute.xlu1 %v1602_v3 }
  0x35   : > { %572 = vperm.xlu1 %1491, %v556_v17  }
  0x36   : > { %577 = vperm.xlu0 %1489, %v557_v18  }
  0x39   : > { %1492 = vset.pattern.permute.xlu1 %v1603_v15 }
  0x3a   : > { %817 = vperm.xlu1 %1492, %v556_v17   ;;  %1493 = vset.pattern.permute.xlu0 %v1604_v19 }
  0x3b   : > { %1087 = vperm.xlu0 %1493, %v554_v14  }
  0x3e   : > { %821 = vperm.xlu1 %1492, %v557_v18  }
  0x3f   : > { %1101 = vperm.xlu0 %1493, %v557_v18  }
  0x42   : > { %1494 = vset.pattern.permute.xlu1 %v1604_v19 }
  0x43   : > { %1091 = vperm.xlu1 %1494, %v555_v13   ;;  %1496 = vset.pattern.permute.xlu0 %v1605_v20 }
  0x44   : > { %1053 = vperm.xlu0 %1496, %v555_v13  }
  0x47   : > { %1097 = vperm.xlu1 %1494, %v556_v17  }
  0x48   : > { %1497 = vset.pattern.permute.xlu0 %v1606_v21 }
  0x49   : > { %1137 = vperm.xlu0 %1497, %v554_v14  }
  0x4b   : > { %1495 = vset.pattern.permute.xlu1 %v1605_v20 }
  0x4c   : > { %1049 = vperm.xlu1 %1495, %v554_v14  }
  0x4d   : > { %1151 = vperm.xlu0 %1497, %v557_v18  }
  0x50   : > { %1059 = vperm.xlu1 %1495, %v556_v17  }
  0x51   : > { %1500 = vset.pattern.permute.xlu0 %v1602_v3 }
  0x52   : > { %801 = vperm.xlu0 %1500, %v553_v22  }
  0x54   : > { %1063 = vperm.xlu1 %1495, %v557_v18  }
  0x56   : > { %1502 = vset.pattern.permute.xlu0 %v1605_v20 }
  0x57   : > { %1075 = vperm.xlu0 %1502, %v552_v23  }
  0x58   : > { %1498 = vset.pattern.permute.xlu1 %v1606_v21 }
  0x59   : > { %1141 = vperm.xlu1 %1498, %v555_v13  }
  0x5b   : > { %1505 = vset.pattern.permute.xlu0 %v1604_v19 }
  0x5c   : > { %1129 = vperm.xlu0 %1505, %v553_v22  }
  0x5d   : > { %1147 = vperm.xlu1 %1498, %v556_v17  }
  0x60   : > { %1507 = vset.pattern.permute.xlu0 %v1602_v3 }
  0x61   : > { %1499 = vset.pattern.permute.xlu1 %v1602_v3 }
  0x62   : > { %796 = vperm.xlu1 %1499, %v552_v23  }
  0x66   : > { %1501 = vset.pattern.permute.xlu1 %v1603_v15 }
  0x67   : > { %1037 = vperm.xlu1 %1501, %v552_v23  }
  0x6b   : > { %1041 = vperm.xlu1 %1501, %v553_v22  }
  0x6f   : > { %1503 = vset.pattern.permute.xlu1 %v1605_v20 }
  0x70   : > { %1079 = vperm.xlu1 %1503, %v553_v22  }
  0x74   : > { %1504 = vset.pattern.permute.xlu1 %v1604_v19 }
  0x75   : > { %1125 = vperm.xlu1 %1504, %v552_v23  }
  0x79   : > { %1506 = vset.pattern.permute.xlu1 %v1606_v21 }
  0x7a   : > { %1165 = vperm.xlu1 %1506, %v552_v23  }
  0x7e   : > { %1169 = vperm.xlu1 %1506, %v553_v22  }
  0x9e   : > { %v527_v41 = vpop.permute.xlu1 %526 }
  0x9f   : > { %v410_v24 = vpop.permute.xlu0 %409 }
  0xa2   : > { %v532_v46 = vpop.permute.xlu1 %531 }
  0xa3   : > { %v405_v26 = vpop.permute.xlu0 %404 }
  0xa6   : > { %v546_v50 = vpop.permute.xlu1 %545 }
  0xa8   : > { %v808_v58 = vpop.permute.xlu0 %807 }
  0xaa   : > { %v566_v54 = vpop.permute.xlu1 %565 }
  0xad   : > { %v541_v63 = vpop.permute.xlu0 %540 }
  0xaf   : > { %v812_v57 = vpop.permute.xlu1 %811 }
  0xb1   : > { %v561_v7 = vpop.permute.xlu0 %560 }
  0xb4   : > { %v573_v59 = vpop.permute.xlu1 %572 }
  0xb5   : > { %v578_v17 = vpop.permute.xlu0 %577 }
  0xb9   : > { %v818_v2 = vpop.permute.xlu1 %817 }
  0xbd   : > { %v822_v9 = vpop.permute.xlu1 %821 }
  0xfa   : > { %v1400_v25 = vpop.f32.mrb[0].mxu0 }
  0xfb   : > { %v491_v27 = vadd.f32 %v1400_v25, %v410_v24  ;;  %v485_v28 = vpop.f32.mrb[1].mxu0 }
  0xfc   : > { %v486_v29 = vadd.f32 %v485_v28, %v405_v26 }
  0xfd   : > { %v495_v30 = vsel %vm494_vm1, %v491_v27, 0.0 }
  0xfe   : > { %v496_v31 = vadd.f32 %v495_v30, %v486_v29 }
 0x100   : > { %v497_v32 = vrot.slane %v496_v31, 4 }
 0x102   : > { %v498_v33 = vadd.f32 %v497_v32, %v496_v31 }
 0x104   : > { %v499_v34 = vrot.slane %v498_v33, 2 }
 0x106   : > { %v500_v35 = vadd.f32 %v499_v34, %v498_v33 }
 0x108   : > { %v501_v36 = vrot.slane %v500_v35, 1 }
 0x10a   : > { %v502_v37 = vadd.f32 %v501_v36, %v500_v35 }
 0x10c   : > { %v504_v38 = vmul.f32 0.11111111, %v502_v37 }
 0x10e   : > { %v505_v39 = vsub.f32 %v486_v29, %v504_v38  ;;  %v506_v40 = vsub.f32 %v491_v27, %v504_v38 }
 0x110   : > { %v507_v42 = vmul.f32 %v505_v39, %v505_v39  ;;  %v508_v43 = vmul.f32 %v506_v40, %v506_v40 }
 0x112   : > { %v509_v44 = vsel %vm494_vm1, %v508_v43, 0.0 }
 0x113   : > { %v510_v45 = vadd.f32 %v509_v44, %v507_v42  ;;  %v1607_v42 = vmov 2475754826  }
 0x115   : > { %v511_v47 = vrot.slane %v510_v45, 4 }
 0x117   : > { %v512_v48 = vadd.f32 %v511_v47, %v510_v45 }
 0x119   : > { %v513_v49 = vrot.slane %v512_v48, 2 }
 0x11b   : > { %v514_v51 = vadd.f32 %v513_v49, %v512_v48  ;;  %v1609_v49 = vmov 2131351028  }
 0x11d   : > { %v515_v52 = vrot.slane %v514_v51, 1 }
 0x11f   : > { %v516_v53 = vadd.f32 %v515_v52, %v514_v51 }
 0x121   : > { %v517_v55 = vmul.f32 0.11111111, %v516_v53 }
 0x123   : > { %v518_v56 = vadd.f32 1e-05, %v517_v55 }
 0x125   : > { %1508 = vrsqrt.f32 %v518_v56 }
 0x12f   : > { %v1509_v60 = vpop.eup %1508 }
 0x130   : > { %v521_v61 = vmul.f32 %v1509_v60, %v506_v40  ;;  %v520_v62 = vmul.f32 %v1509_v60, %v505_v39 }
 0x132   : > { %v535_v0 = vmul.f32 %v532_v46, %v521_v61  ;;  %v534_v1 = vmul.f32 %v527_v41, %v520_v62  ;;  %v1608_v46 = vmov 683565275   ;;  %v1611_v62 = vmov 920167782  }
 0x134   : > { %v549_v3 = vadd.f32 %v546_v50, %v535_v0  ;;  %v548_v4 = vadd.f32 %v541_v63, %v534_v1 }
 0x136   : > { %v1786_v5 = vmax.f32 %v549_v3, 0.0  ;;  %v1788_v6 = vmax.f32 %v548_v4, 0.0  ;;  %v1612_v4 = vmov 1326507024  }
 0x138   : > { %v815_v8 = vmul.f32 %v812_v57, %v1786_v5  ;;  %v814_v10 = vmul.f32 %v808_v58, %v1788_v6  ;;  %v568_v11 = vmul.f32 %v561_v7, %v1788_v6  ;;  %v569_v13 = vmul.f32 %v566_v54, %v1786_v5 }
 0x139   : > { %v1610_v58 = vmov 2102212464  }
 0x13a   : > { %v825_v12 = vadd.f32 %v822_v9, %v815_v8  ;;  %v580_v14 = vadd.f32 %v573_v59, %v568_v11  ;;  %v824_v18 = vadd.f32 %v818_v2, %v814_v10  ;;  %v581_v20 = vadd.f32 %v578_v17, %v569_v13 }
 0x13c   : > { %v1794_v15 = vclamps-f32 %v825_v12, 10.0  ;;  %v1796_v16 = vclamps-f32 %v580_v14, 10.0  ;;  %v1800_v24 = vclamps-f32 %v824_v18, 10.0  ;;  %v1802_v25 = vclamps-f32 %v581_v20, 10.0 }
 0x13e   : > { %v936_v19 = vand.u32 2139095040, %v1794_v15  ;;  %v589_v21 = vand.u32 2139095040, %v1796_v16  ;;  %v586_v28 = vand.u32 2147483647, %v1796_v16  ;;  %v833_v30 = vand.u32 2139095040, %v1800_v24 }
 0x13f   : > { %v693_v31 = vand.u32 2139095040, %v1802_v25  ;;  %v830_v34 = vand.u32 2147483647, %v1800_v24 }
 0x140   : > { %v937_v22 = vshrl.u32 %v936_v19, 23  ;;  %v590_v23 = vshrl.u32 %v589_v21, 23  ;;  %v593_v33 = vand.u32 8388607, %v586_v28  ;;  %v834_v37 = vshrl.u32 %v833_v30, 23  ;;  %v1088_v21 = vpop.permute.xlu0 %1087 }
 0x141   : > { %v694_v38 = vshrl.u32 %v693_v31, 23  ;;  %v837_v41 = vand.u32 8388607, %v830_v34 }
 0x142   : > { %v1368_v26 = vadd.s32 4294967169, %v937_v22  ;;  %v1354_v27 = vadd.s32 4294967169, %v590_v23  ;;  %v594_v40 = vor.u32 8388608, %v593_v33  ;;  %v1364_v44 = vadd.s32 4294967169, %v834_v37 }
 0x143   : > { %v1358_v52 = vadd.s32 4294967169, %v694_v38  ;;  %v838_v54 = vor.u32 8388608, %v837_v41  ;;  %v933_v41 = vand.u32 2147483647, %v1794_v15 }
 0x144   : > { %v596_v29 = vadd.s32 1, %v1354_v27  ;;  %v943_v32 = vadd.s32 1, %v1368_v26  ;;  %v1816_v53 = vshll.u32 %v594_v40, 8  ;;  %v840_v0 = vadd.s32 1, %v1364_v44 }
 0x145   : > { %v1834_v27 = vmul.f32 %v1088_v21, %v1788_v6  ;;  %v1841_v33 = vadd.s32 1, %v1358_v52  ;;  %v1851_v40 = vshll.u32 %v838_v54, 8 }
 0x146   : > { %vm597_vm2 = vcmp.gt.s32.totalorder %v596_v29, 0  ;;  %vm944_vm3 = vcmp.gt.s32.totalorder %v943_v32, 0  ;;  %vm841_vm8 = vcmp.gt.s32.totalorder %v840_v0, 0 }
 0x147   : > { %v598_v35 = vsel %vm597_vm2, %v596_v29, 0  ;;  %v945_v45 = vsel %vm944_vm3, %v943_v32, 0  ;;  %v842_v32 = vsel %vm841_vm8, %v840_v0, 0  ;;  %vm701_vm14 = vcmp.gt.s32.totalorder %v1841_v33, 0 }
 0x148   : > { %v600_v36 = vand.u32 31, %v598_v35  ;;  %v599_v51 = vshrl.u32 %v598_v35, 5  ;;  %v1820_v60 = vand.u32 31, %v945_v45  ;;  %v844_v37 = vand.u32 31, %v842_v32 }
 0x149   : > { %v1847_v38 = vshrl.u32 %v945_v45, 5  ;;  %vm2003_vm8 = vcmp.le.f32.partialorder %v586_v28, 0.7853982 }
 0x14a   : > { %v601_v39 = vsub.s32 32, %v600_v36  ;;  %v603_v47 = vshll.u32 %v1608_v46, %v600_v36  ;;  %v606_v48 = vshll.u32 %v1607_v42, %v600_v36  ;;  %v609_v57 = vshll.u32 %v1609_v49, %v600_v36 }
 0x14b   : > { %v612_v61 = vshll.u32 %v1610_v58, %v600_v36  ;;  %v615_v3 = vshll.u32 %v1611_v62, %v600_v36  ;;  %vm618_vm4 = vcmp.lt.s32.totalorder %v599_v51, 1  ;;  %vm620_vm5 = vcmp.lt.s32.totalorder %v599_v51, 3 }
 0x14c   : > { %v604_v43 = vshrl.u32 %v1607_v42, %v601_v39  ;;  %v607_v50 = vshrl.u32 %v1609_v49, %v601_v39  ;;  %v610_v59 = vshrl.u32 %v1610_v58, %v601_v39  ;;  %v613_v63 = vshrl.u32 %v1611_v62, %v601_v39 }
 0x14d   : > { %v602_v1 = vshrl.u32 %v1608_v46, %v601_v39  ;;  %v616_v7 = vshrl.u32 %v1612_v4, %v601_v39  ;;  %vm621_vm6 = vcmp.lt.s32.totalorder %v599_v51, 4  ;;  %v1828_v13 = vsub.s32 32, %v1820_v60 }
 0x14e   : > { %v605_v55 = vor.u32 %v604_v43, %v603_v47  ;;  %v608_v56 = vor.u32 %v607_v50, %v606_v48  ;;  %v611_v2 = vor.u32 %v610_v59, %v609_v57  ;;  %v614_v8 = vor.u32 %v613_v63, %v612_v61 }
 0x14f   : > { %v617_v9 = vor.u32 %v616_v7, %v615_v3  ;;  %vm619_vm7 = vcmp.lt.s32.totalorder %v599_v51, 2  ;;  %v960_v39 = vshrl.u32 %v1611_v62, %v1828_v13  ;;  %v1856_v43 = vshrl.u32 %v1612_v4, %v1828_v13 }
 0x150   : > { %v622_v10 = vsel %vm618_vm4, %v602_v1, %v605_v55  ;;  %v623_v11 = vsel %vm621_vm6, %v611_v2, 2102212464  ;;  %v626_v12 = vsel %vm618_vm4, %v605_v55, %v608_v56  ;;  %v627_v17 = vsel %vm621_vm6, %v614_v8, 920167782 }
 0x151   : > { %v624_v14 = vsel %vm620_vm5, %v608_v56, %v623_v11  ;;  %v630_v18 = vsel %vm618_vm4, %v608_v56, %v611_v2  ;;  %v628_v19 = vsel %vm620_vm5, %v611_v2, %v627_v17  ;;  %v631_v20 = vsel %vm621_vm6, %v617_v9, 1326507024  ;;  %v1177_v2 = vld [vmem:[%s2271_s9] sm:$0xff] }
 0x152   : > { %v625_v22 = vsel %vm619_vm7, %v622_v10, %v624_v14  ;;  %v629_v23 = vsel %vm619_vm7, %v626_v12, %v628_v19  ;;  %v632_v26 = vsel %vm620_vm5, %v614_v8, %v631_v20  ;;  %v843_v47 = vshrl.u32 %v842_v32, 5  ;;  %1180 = vperm.xlu0 %1507, %v1177_v2   ;;  %v1877_v10 = vpop.permute.xlu1 %1091 }
 0x153   : > { %v633_v29 = vsel %vm619_vm7, %v630_v18, %v632_v26  ;;  %v1837_v30 = vmul.u32.u64.low %v1816_v53, %v629_v23  ;;  %v1838_v31 = vmul.u32.u64.high %v1816_v53, %v629_v23, %v1837_v30  ;;  %v641_v44 = vmul.u32 %v1816_v53, %v625_v22 }
 0x154   : > { %v1844_v35 = vmul.u32.u64.low %v1816_v53, %v633_v29  ;;  %v1845_v36 = vmul.u32.u64.high %v1816_v53, %v633_v29, %v1844_v35  ;;  %v845_v48 = vsub.s32 32, %v844_v37  ;;  %v847_v45 = vshll.u32 %v1608_v46, %v844_v37 }
 0x155   : > { %v644_v50 = vadd.s32 1, %v1838_v31  ;;  %v850_v51 = vshll.u32 %v1607_v42, %v844_v37  ;;  %v853_v52 = vshll.u32 %v1609_v49, %v844_v37  ;;  %v856_v55 = vshll.u32 %v1610_v58, %v844_v37 }
 0x156   : > { %vm643_vm9 = vc.u32 %v1845_v36, %v1837_v30  ;;  %v848_v54 = vshrl.u32 %v1607_v42, %v845_v48  ;;  %v859_v56 = vshll.u32 %v1611_v62, %v844_v37  ;;  %v851_v57 = vshrl.u32 %v1609_v49, %v845_v48 }
 0x157   : > { %v645_v53 = vsel %vm643_vm9, %v644_v50, %v1838_v31  ;;  %v854_v59 = vshrl.u32 %v1610_v58, %v845_v48  ;;  %v857_v61 = vshrl.u32 %v1611_v62, %v845_v48  ;;  %v860_v1 = vshrl.u32 %v1612_v4, %v845_v48 }
 0x158   : > { %v646_v63 = vadd.s32 %v645_v53, %v641_v44  ;;  %v849_v0 = vor.u32 %v848_v54, %v847_v45  ;;  %vm862_vm10 = vcmp.lt.s32.totalorder %v843_v47, 1  ;;  %v846_v3 = vshrl.u32 %v1608_v46, %v845_v48 }
 0x159   : > { %v852_v7 = vor.u32 %v851_v57, %v850_v51  ;;  %v855_v8 = vor.u32 %v854_v59, %v853_v52  ;;  %v858_v9 = vor.u32 %v857_v61, %v856_v55  ;;  %v861_v12 = vor.u32 %v860_v1, %v859_v56  ;;  %v1098_v55 = vpop.permute.xlu1 %1097 }
 0x15a   : > { %v647_v11 = vadd.s32 536870912, %v646_v63  ;;  %vm864_vm11 = vcmp.lt.s32.totalorder %v843_v47, 3  ;;  %vm865_vm12 = vcmp.lt.s32.totalorder %v843_v47, 4  ;;  %vm863_vm13 = vcmp.lt.s32.totalorder %v843_v47, 2 }
 0x15b   : > { %v867_v14 = vsel %vm865_vm12, %v855_v8, 2102212464  ;;  %v870_v17 = vsel %vm862_vm10, %v849_v0, %v852_v7  ;;  %v871_v18 = vsel %vm865_vm12, %v858_v9, 920167782  ;;  %v874_v19 = vsel %vm862_vm10, %v852_v7, %v855_v8 }
 0x15c   : > { %v1881_v20 = vshrl.u32 %v647_v11, 30  ;;  %v872_v21 = vsel %vm864_vm11, %v855_v8, %v871_v18  ;;  %v875_v22 = vsel %vm865_vm12, %v861_v12, 1326507024  ;;  %v959_v23 = vshll.u32 %v1610_v58, %v1820_v60 }
 0x15d   : > { %v962_v26 = vshll.u32 %v1611_v62, %v1820_v60  ;;  %v873_v29 = vsel %vm863_vm13, %v870_v17, %v872_v21  ;;  %v876_v31 = vsel %vm864_vm11, %v858_v9, %v875_v22  ;;  %v866_v35 = vsel %vm862_vm10, %v846_v3, %v849_v0 }
 0x15e   : > { %v649_v32 = vshll.u32 %v1881_v20, 30  ;;  %v868_v37 = vsel %vm864_vm11, %v852_v7, %v867_v14  ;;  %v877_v44 = vsel %vm863_vm13, %v874_v19, %v876_v31  ;;  %v961_v52 = vor.u32 %v960_v39, %v959_v23  ;;  %v1050_v14 = vpop.permute.xlu1 %1049 }
 0x15f   : > { %v1895_v48 = vmul.u32.u64.low %v1851_v40, %v877_v44  ;;  %v1896_v50 = vmul.u32.u64.high %v1851_v40, %v877_v44, %v1895_v48  ;;  %v1899_v45 = vmul.u32.u64.low %v1851_v40, %v873_v29  ;;  %v1900_v51 = vmul.u32.u64.high %v1851_v40, %v873_v29, %v1899_v45 }
 0x160   : > { %v964_v54 = vor.u32 %v1856_v43, %v962_v26  ;;  %v1905_v56 = vsub.s32 %v646_v63, %v649_v32  ;;  %v869_v53 = vsel %vm863_vm13, %v866_v35, %v868_v37  ;;  %v950_v57 = vshll.u32 %v1608_v46, %v1820_v60 }
 0x161   : > { %v951_v59 = vshrl.u32 %v1607_v42, %v1828_v13  ;;  %v954_v61 = vshrl.u32 %v1609_v49, %v1828_v13  ;;  %v953_v43 = vshll.u32 %v1607_v42, %v1820_v60  ;;  %v956_v63 = vshll.u32 %v1609_v49, %v1820_v60 }
 0x162   : > { %v652_v39 = vsub.s32 0, %v1905_v56  ;;  %v957_v47 = vshrl.u32 %v1610_v58, %v1828_v13  ;;  %vm968_vm15 = vcmp.lt.s32.totalorder %v1847_v38, 4  ;;  %vm887_vm0 = vc.u32 %v1896_v50, %v1899_v45 }
 0x163   : > { %v888_v0 = vadd.s32 1, %v1900_v51  ;;  %v940_v1 = vand.u32 8388607, %v933_v41  ;;  %v952_v3 = vor.u32 %v951_v59, %v950_v57  ;;  %v955_v7 = vor.u32 %v954_v61, %v953_v43 }
 0x164   : > { %v1355_v2 = vmin.u32 %v652_v39, %v1905_v56  ;;  %v958_v8 = vor.u32 %v957_v47, %v956_v63  ;;  %v974_v60 = vsel %vm968_vm15, %v961_v52, 920167782  ;;  %v885_v9 = vmul.u32 %v1851_v40, %v869_v53 }
 0x165   : > { %v889_v11 = vsel %vm887_vm0, %v888_v0, %v1900_v51  ;;  %v978_v12 = vsel %vm968_vm15, %v964_v54, 1326507024  ;;  %v1937_v17 = vsel %vm701_vm14, %v1841_v33, 0  ;;  %v1940_v19 = vadd.f32 %v1098_v55, %v1834_v27  ;;  %v1965_v55 = vpop.permute.xlu1 %1059 }
 0x166   : > { %v654_v18 = vclz %v1355_v2  ;;  %v890_v21 = vadd.s32 %v889_v11, %v885_v9  ;;  %v941_v22 = vor.u32 8388608, %v940_v1  ;;  %vm965_vm2 = vcmp.lt.s32.totalorder %v1847_v38, 1 }
 0x167   : > { %vm967_vm3 = vcmp.lt.s32.totalorder %v1847_v38, 3  ;;  %v973_v23 = vsel %vm965_vm2, %v952_v3, %v955_v7  ;;  %v977_v33 = vsel %vm965_vm2, %v955_v7, %v958_v8  ;;  %vm966_vm4 = vcmp.lt.s32.totalorder %v1847_v38, 2 }
 0x168   : > { %v1356_v40 = vadd.s32 4294967294, %v654_v18  ;;  %v975_v26 = vsel %vm967_vm3, %v958_v8, %v974_v60  ;;  %v891_v29 = vadd.s32 536870912, %v890_v21  ;;  %v970_v27 = vsel %vm968_vm15, %v958_v8, 2102212464 }
 0x169   : > { %v979_v31 = vsel %vm967_vm3, %v961_v52, %v978_v12  ;;  %v642_v32 = vadd.s32 %v1837_v30, %v1845_v36  ;;  %v949_v35 = vshrl.u32 %v1608_v46, %v1828_v13  ;;  %v976_v51 = vsel %vm966_vm4, %v973_v23, %v975_v26  ;;  %v1988_v60 = vpop.permute.xlu1 %1063 }
 0x16a   : > { %vm1357_vm5 = vcmp.lt.s32.totalorder %v1356_v40, 0  ;;  %v980_v37 = vsel %vm966_vm4, %v977_v33, %v979_v31  ;;  %v1961_v48 = vshrl.u32 %v891_v29, 30  ;;  %v981_v54 = vshll.u32 %v941_v22, 8 }
 0x16b   : > { %v657_v44 = vsel %vm1357_vm5, 0, %v1356_v40  ;;  %v969_v30 = vsel %vm965_vm2, %v949_v35, %v952_v3  ;;  %v971_v13 = vsel %vm967_vm3, %v955_v7, %v970_v27  ;;  %v1374_v0 = vclamps-f32 %v1940_v19, 10.0 }
 0x16c   : > { %v658_v52 = vsub.s32 32, %v657_v44  ;;  %v662_v53 = vsub.s32 4294967266, %v657_v44  ;;  %v659_v36 = vshll.u32 %v1905_v56, %v657_v44  ;;  %v893_v57 = vshll.u32 %v1961_v48, 30 }
 0x16d   : > { %v1973_v59 = vmul.u32.u64.low %v981_v54, %v980_v37  ;;  %v1974_v61 = vmul.u32.u64.high %v981_v54, %v980_v37, %v1973_v59  ;;  %v1976_v63 = vmul.u32.u64.low %v981_v54, %v976_v51  ;;  %v1977_v47 = vmul.u32.u64.high %v981_v54, %v976_v51, %v1976_v63  ;;  %v2007_v37 = vpop.permute.xlu1 %1141 }
 0x16e   : > { %v660_v39 = vshrl.u32 %v642_v32, %v658_v52  ;;  %v663_v43 = vadd.s32 127, %v662_v53  ;;  %v894_v1 = vsub.s32 %v890_v21, %v893_v57  ;;  %v1982_v2 = vand.u32 31, %v1937_v17 }
 0x16f   : > { %v972_v56 = vsel %vm966_vm4, %v969_v30, %v971_v13  ;;  %vm990_vm6 = vc.u32 %v1974_v61, %v1976_v63  ;;  %v991_v11 = vadd.s32 1, %v1977_v47  ;;  %v1376_v12 = vmul.f32 -1.442695, %v1374_v0 }
 0x170   : > { %v661_v3 = vor.u32 %v660_v39, %v659_v36  ;;  %v664_v7 = vshll.u32 %v663_v43, 23  ;;  %v896_v8 = vsub.s32 0, %v894_v1  ;;  %v988_v21 = vmul.u32 %v981_v54, %v972_v56 }
 0x171   : > { %v1994_v22 = vsub.s32 32, %v1982_v2  ;;  %v992_v23 = vsel %vm990_vm6, %v991_v11, %v1977_v47  ;;  %v1998_v29 = vmul.f32 %v1050_v14, %v1788_v6  ;;  %vm588_vm7 = vcmp.lt.s32.totalorder %v1796_v16, 0  ;;  %v2039_v11 = vpop.permute.xlu1 %1147 }
 0x172   : > { %v665_v9 = vor.u32 4788187, %v664_v7  ;;  %v1365_v18 = vmin.u32 %v896_v8, %v894_v1  ;;  %v668_v38 = vcvt.s32.f32 %v661_v3  ;;  %v993_v33 = vadd.s32 %v992_v23, %v988_v21  ;;  %v2047_v21 = vpop.permute.xlu0 %1101 }
 0x173   : > { %1510 = vpow2.f32 %v1376_v12  ;;  %v720_v44 = vshrl.u32 %v1612_v4, %v1994_v22  ;;  %v672_v14 = vsub.s32 4, %v1881_v20  ;;  %v690_v54 = vand.u32 2147483647, %v1802_v25 }
 0x174   : > { %v666_v40 = vand.u32 2147483647, %v665_v9  ;;  %v898_v26 = vclz %v1365_v18  ;;  %v994_v35 = vadd.s32 536870912, %v993_v33  ;;  %v2014_v52 = vshrl.u32 %v1937_v17, 5 }
 0x175   : > { %v716_v28 = vshll.u32 %v1610_v58, %v1982_v2  ;;  %v717_v30 = vshrl.u32 %v1611_v62, %v1994_v22  ;;  %v719_v4 = vshll.u32 %v1611_v62, %v1982_v2  ;;  %v886_v57 = vadd.s32 %v1899_v45, %v1896_v50 }
 0x176   : > { %v669_v27 = vmul.f32 %v668_v38, %v666_v40  ;;  %v1366_v32 = vadd.s32 4294967294, %v898_v26  ;;  %v2018_v53 = vshrl.u32 %v994_v35, 30  ;;  %v673_v47 = vsel %vm588_vm7, %v672_v14, %v1881_v20 }
 0x177   : > { %v721_v43 = vor.u32 %v720_v44, %v719_v4  ;;  %v697_v3 = vand.u32 8388607, %v690_v54  ;;  %v708_v9 = vshrl.u32 %v1607_v42, %v1994_v22  ;;  %v710_v45 = vshll.u32 %v1607_v42, %v1982_v2 }
 0x178   : > { %v670_v51 = vxor.u32 2147483648, %v669_v27  ;;  %vm1367_vm9 = vcmp.lt.s32.totalorder %v1366_v32, 0  ;;  %v996_v62 = vshll.u32 %v2018_v53, 30  ;;  %v711_v20 = vshrl.u32 %v1609_v49, %v1994_v22 }
 0x179   : > { %v901_v36 = vsel %vm1367_vm9, 0, %v1366_v32  ;;  %v714_v40 = vshrl.u32 %v1610_v58, %v1994_v22  ;;  %v718_v38 = vor.u32 %v717_v30, %v716_v28  ;;  %v675_v23 = vsel %vm2003_vm8, 0, %v673_v47  ;;  %v2065_v30 = vpop.permute.xlu1 %796 }
 0x17a   : > { %v671_v13 = vsel %vm588_vm7, %v670_v51, %v669_v27  ;;  %v902_v59 = vsub.s32 32, %v901_v36  ;;  %v906_v39 = vsub.s32 4294967266, %v901_v36  ;;  %v903_v7 = vshll.u32 %v894_v1, %v901_v36 }
 0x17b   : > { %v674_v17 = vsel %vm2003_vm8, %v1796_v16, %v671_v13  ;;  %v2041_v50 = vsub.s32 %v993_v33, %v996_v62  ;;  %v713_v1 = vshll.u32 %v1609_v49, %v1982_v2  ;;  %v707_v27 = vshll.u32 %v1608_v46, %v1982_v2 }
 0x17c   : > { %v904_v56 = vshrl.u32 %v886_v57, %v902_v59  ;;  %v907_v8 = vadd.s32 127, %v906_v39  ;;  %1512 = vcosq.f32 %v674_v17  ;;  %v712_v32 = vor.u32 %v711_v20, %v710_v45 }
 0x17d   : > { %1514 = vsinq.f32 %v674_v17  ;;  %v999_v42 = vsub.s32 0, %v2041_v50  ;;  %v1511_v26 = vpop.eup %1510  ;;  %v715_v35 = vor.u32 %v714_v40, %v713_v1  ;;  %vm725_vm10 = vcmp.lt.s32.totalorder %v2014_v52, 4  ;;  %v2069_v17 = vpop.permute.xlu0 %1053 }
 0x17e   : > { %v905_v12 = vor.u32 %v904_v56, %v903_v7  ;;  %v908_v18 = vshll.u32 %v907_v8, 23  ;;  %vm832_vm11 = vcmp.lt.s32.totalorder %v1800_v24, 0  ;;  %v698_v58 = vor.u32 8388608, %v697_v3 }
 0x17f   : > { %v1369_v49 = vmin.u32 %v999_v42, %v2041_v50  ;;  %v735_v31 = vsel %vm725_vm10, %v721_v43, 1326507024  ;;  %v709_v14 = vor.u32 %v708_v9, %v707_v27  ;;  %v731_v28 = vsel %vm725_vm10, %v718_v38, 920167782 }
 0x180   : > { %v909_v33 = vor.u32 4788187, %v908_v18  ;;  %v912_v51 = vcvt.s32.f32 %v905_v12  ;;  %v679_v2 = vadd.s32 3, %v675_v23  ;;  %vm722_vm12 = vcmp.lt.s32.totalorder %v2014_v52, 1 }
 0x181   : > { %v1001_v4 = vclz %v1369_v49  ;;  %v916_v36 = vsub.s32 4, %v1961_v48  ;;  %vm724_vm13 = vcmp.lt.s32.totalorder %v2014_v52, 3  ;;  %v734_v57 = vsel %vm722_vm12, %v712_v32, %v715_v35 }
 0x182   : > { %v910_v44 = vand.u32 2147483647, %v909_v33  ;;  %vm723_vm14 = vcmp.lt.s32.totalorder %v2014_v52, 2  ;;  %v736_v39 = vsel %vm724_vm13, %v718_v38, %v735_v31  ;;  %v2077_v43 = vshll.u32 %v698_v58, 8  ;;  %v2103_v38 = vpop.permute.xlu1 %1037 }
 0x183   : > { %v1370_v59 = vadd.s32 4294967294, %v1001_v4  ;;  %v730_v62 = vsel %vm722_vm12, %v709_v14, %v712_v32  ;;  %v732_v3 = vsel %vm724_vm13, %v715_v35, %v731_v28  ;;  %v737_v7 = vsel %vm723_vm14, %v734_v57, %v736_v39 }
 0x184   : > { %v913_v13 = vmul.f32 %v912_v51, %v910_v44  ;;  %vm2087_vm15 = vcmp.le.f32.partialorder %v830_v34, 0.7853982  ;;  %v2092_v9 = vmul.u32.u64.low %v2077_v43, %v737_v7  ;;  %v2093_v45 = vmul.u32.u64.high %v2077_v43, %v737_v7, %v2092_v9 }
 0x185   : > { %vm1371_vm0 = vcmp.lt.s32.totalorder %v1370_v59, 0  ;;  %v727_v18 = vsel %vm725_vm10, %v715_v35, 2102212464  ;;  %v1066_v1 = vadd.f32 %v1965_v55, %v1998_v29  ;;  %v1116_v40 = vadd.f32 1.0, %v1511_v26  ;;  %v1138_v29 = vpop.permute.xlu0 %1137 }
 0x186   : > { %v914_v47 = vxor.u32 2147483648, %v913_v13  ;;  %v1513_v56 = vpop.eup %1512  ;;  %v2097_v12 = vsel %vm1371_vm0, 0, %v1370_v59  ;;  %v706_v42 = vshrl.u32 %v1608_v46, %v1994_v22  ;;  %v733_v33 = vsel %vm723_vm14, %v730_v62, %v732_v3 }
 0x187   : > { %v1515_v34 = vpop.eup %1514  ;;  %v680_v27 = vand.u32 3, %v679_v2  ;;  %v917_v35 = vsel %vm832_vm11, %v916_v36, %v1961_v48  ;;  %v1009_v55 = vsub.s32 4294967266, %v2097_v12  ;;  %v686_v26 = vxor.u32 2147483648, %v1513_v56  ;;  %v2130_v2 = vpop.permute.xlu1 %1041 }
 0x188   : > { %v915_v20 = vsel %vm832_vm11, %v914_v47, %v913_v13  ;;  %v726_v49 = vsel %vm722_vm12, %v706_v42, %v709_v14  ;;  %v728_v46 = vsel %vm724_vm13, %v712_v32, %v727_v18  ;;  %v683_v22 = vxor.u32 2147483648, %v1515_v34 }
 0x189   : > { %v918_v23 = vsel %vm2087_vm15, %v1800_v24, %v915_v20  ;;  %v2121_v58 = vmul.u32.u64.low %v2077_v43, %v733_v33  ;;  %v2122_v31 = vmul.u32.u64.high %v2077_v43, %v733_v33, %v2121_v58  ;;  %v1372_v44 = vclamps-f32 %v1066_v1, 10.0 }
 0x18a   : > { %1516 = vcosq.f32 %v918_v23  ;;  %v1010_v48 = vadd.s32 127, %v1009_v55  ;;  %v1144_v51 = vmul.f32 %v1138_v29, %v1788_v6  ;;  %vm682_vm2 = vcmp.eq.s32.totalorder %v680_v27, 0  ;;  %v2135_v6 = vpop.permute.xlu0 %1151 }
 0x18b   : > { %1518 = vsinq.f32 %v918_v23  ;;  %vm685_vm3 = vcmp.eq.s32.totalorder %v680_v27, 2  ;;  %v919_v28 = vsel %vm2087_vm15, 0, %v917_v35  ;;  %v729_v14 = vsel %vm723_vm14, %v726_v49, %v728_v46 }
 0x18c   : > { %1520 = vrcp.f32 %v1116_v40  ;;  %v1613_v32 = vmov 0.0|0.0   ;;  %v1005_v4 = vsub.s32 32, %v2097_v12  ;;  %vm747_vm4 = vc.u32 %v2093_v45, %v2121_v58 }
 0x18d   : > { %1412 = vmatprep.subr.bf16.mxu1 %v1613_v32  ;;  %v684_v13 = vsel %vm682_vm2, %v1513_v56, %v683_v22  ;;  %v687_v36 = vsel %vm685_vm3, %v686_v26, %v1515_v34  ;;  %v748_v57 = vadd.s32 1, %v2122_v31  ;;  %1522 = vtanh.f32 %v1372_v44 }
 0x18e   : > { %vm1614_vm5 = vmmov 0   ;;  %v1615_v59 = vmov 0.0   ;;  %v989_v52 = vadd.s32 %v1976_v63, %v1974_v61  ;;  %v1011_v39 = vshll.u32 %v1010_v48, 23  ;;  %v2144_v18 = vpop.permute.xlu0 %801 }
 0x18f   : > { %1405 = vmatprep.mubr.msk.f32.mxu1 %vm1614_vm5, %v1615_v59  ;;  %v745_v47 = vmul.u32 %v2077_v43, %v729_v14  ;;  %vm681_vm6 = vcmp.lt.s32.totalorder %v680_v27, 2  ;;  %v923_v62 = vand.u32 3, %v919_v28  ;;  %v1154_v3 = vadd.f32 %v2039_v11, %v1144_v51  ;;  %v2148_v43 = vpop.permute.xlu1 %1079 }
 0x190   : > { %v749_v7 = vsel %vm747_vm4, %v748_v57, %v2122_v31  ;;  %v688_v56 = vsel %vm681_vm6, %v684_v13, %v687_v36  ;;  %v1007_v8 = vshrl.u32 %v989_v52, %v1005_v4  ;;  %vm678_vm7 = vweird.f32 %v1796_v16 }
 0x191   : > { %v750_v9 = vadd.s32 %v749_v7, %v745_v47  ;;  %v1006_v61 = vshll.u32 %v2041_v50, %v2097_v12  ;;  %v1012_v63 = vor.u32 4788187, %v1011_v39  ;;  %v689_v11 = vsel %vm678_vm7, nan, %v688_v56 }
 0x192   : > { %vm928_vm8 = vcmp.eq.s32.totalorder %v923_v62, 2  ;;  %v1378_v42 = vclamps-f32 %v1154_v3, 10.0  ;;  %vm925_vm9 = vcmp.eq.s32.totalorder %v923_v62, 0  ;;  %vm922_vm10 = vweird.f32 %v1800_v24  ;;  %v1076_v44 = vpop.permute.xlu0 %1075 }
 0x193   : > { %v751_v40 = vadd.s32 536870912, %v750_v9  ;;  %v1008_v35 = vor.u32 %v1007_v8, %v1006_v61  ;;  %vm924_vm11 = vcmp.lt.s32.totalorder %v923_v62, 2  ;;  %v804_v50 = vmul.f32 %v2065_v30, %v689_v11  ;;  %v1126_v28 = vpop.permute.xlu1 %1125 }
 0x194   : > { %v1517_v20 = vpop.eup %1516  ;;  %v1013_v29 = vand.u32 2147483647, %v1012_v63  ;;  %v1095_v46 = vmul.f32 %v1877_v10, %v1786_v5  ;;  %v1160_v31 = vmax.f32 %v1378_v42, 0.0  ;;  %vm935_vm12 = vcmp.lt.s32.totalorder %v1794_v15, 0 }
 0x195   : > { %v1519_v1 = vpop.eup %1518  ;;  %v929_v34 = vxor.u32 2147483648, %v1517_v20  ;;  %v2150_v16 = vshrl.u32 %v751_v40, 30  ;;  %v1015_v51 = vcvt.s32.f32 %v1008_v35  ;;  %vm2173_vm14 = vcmp.le.f32.partialorder %v933_v41, 0.7853982 }
 0x196   : > { %v926_v23 = vxor.u32 2147483648, %v1519_v1  ;;  %v1521_v33 = vpop.eup %1520  ;;  %v2161_v36 = vadd.f32 %v2047_v21, %v1095_v46  ;;  %v1162_v57 = vmul.f32 %v1378_v42, %v1160_v31  ;;  %vm692_vm15 = vcmp.lt.s32.totalorder %v1802_v25, 0 }
 0x197   : > { %v930_v27 = vsel %vm928_vm8, %v929_v34, %v1519_v1  ;;  %v753_v26 = vshll.u32 %v2150_v16, 30  ;;  %v1523_v49 = vpop.eup %1522  ;;  %v1122_v14 = vmul.f32 %v1521_v33, %v1374_v0  ;;  %v1016_v32 = vmul.f32 %v1015_v51, %v1013_v29  ;;  %v1166_v47 = vpop.permute.xlu1 %1165 }
 0x198   : > { %v927_v55 = vsel %vm925_vm9, %v1517_v20, %v926_v23  ;;  %v1082_v13 = vmul.f32 %v1523_v49, %v1076_v44  ;;  %v1375_v62 = vclamps-f32 %v2161_v36, 10.0  ;;  %v1172_v3 = vmul.f32 %v1166_v47, %v1162_v57 }
 0x199   : > { %v931_v12 = vsel %vm924_vm11, %v927_v55, %v930_v27  ;;  %v754_v24 = vsub.s32 %v750_v9, %v753_v26  ;;  %v1132_v52 = vmul.f32 %v1126_v28, %v1122_v14  ;;  %v1017_v39 = vxor.u32 2147483648, %v1016_v32 }
 0x19a   : > { %v932_v22 = vsel %vm922_vm10, nan, %v931_v12  ;;  %v1377_v56 = vmul.f32 -1.442695, %v1375_v62  ;;  %v746_v20 = vadd.s32 %v2121_v58, %v2093_v45  ;;  %v1019_v33 = vsub.s32 4, %v2018_v53 }
 0x19b   : > { %v1044_v48 = vmul.f32 %v2103_v38, %v932_v22  ;;  %v756_v4 = vsub.s32 0, %v754_v24  ;;  %v1018_v21 = vsel %vm935_vm12, %v1017_v39, %v1016_v32  ;;  %v1057_v45 = vmul.f32 %v2069_v17, %v1786_v5 }
 0x19c   : > { %v1021_v61 = vsel %vm2173_vm14, %v1794_v15, %v1018_v21  ;;  %1524 = vpow2.f32 %v1377_v56  ;;  %v776_v55 = vsub.s32 4, %v2150_v16  ;;  %vm691_vm0 = vcmp.le.f32.partialorder %v690_v54, 0.7853982 }
 0x19d   : > { %v1046_v30 = vadd.f32 %v1044_v48, %v804_v50  ;;  %v1359_v10 = vmin.u32 %v756_v4, %v754_v24  ;;  %1526 = vcosq.f32 %v1021_v61  ;;  %v1020_v50 = vsel %vm935_vm12, %v1019_v33, %v2018_v53 }
 0x19e   : > { %1528 = vsinq.f32 %v1021_v61  ;;  %v1067_v26 = vadd.f32 %v1988_v60, %v1057_v45  ;;  %v1022_v46 = vsel %vm2173_vm14, 0, %v1020_v50  ;;  %v777_v22 = vsel %vm692_vm15, %v776_v55, %v2150_v16 }
 0x19f   : > { %v1084_v59 = vadd.f32 %v1082_v13, %v1046_v30  ;;  %v758_v38 = vclz %v1359_v10  ;;  %v1026_v48 = vand.u32 3, %v1022_v46  ;;  %v779_v51 = vsel %vm691_vm0, 0, %v777_v22 }
 0x1a0   : > { %v1145_v14 = vmul.f32 %v2007_v37, %v1786_v5  ;;  %v783_v30 = vadd.s32 3, %v779_v51  ;;  %vm1025_vm5 = vweird.f32 %v1794_v15  ;;  %vm782_vm9 = vweird.f32 %v1802_v25 }
 0x1a1   : > { %v1134_v7 = vadd.f32 %v1132_v52, %v1084_v59  ;;  %v1360_v19 = vadd.s32 4294967294, %v758_v38  ;;  %vm1028_vm2 = vcmp.eq.s32.totalorder %v1026_v48, 0  ;;  %vm1031_vm3 = vcmp.eq.s32.totalorder %v1026_v48, 2 }
 0x1a2   : > { %v1155_v32 = vadd.f32 %v2135_v6, %v1145_v14  ;;  %vm1027_vm4 = vcmp.lt.s32.totalorder %v1026_v48, 2  ;;  %v784_v4 = vand.u32 3, %v783_v30  ;;  %vm1616_vm10 = vmmov 1  }
 0x1a3   : > { %v2165_v0 = vadd.f32 %v1172_v3, %v1134_v7  ;;  %vm1361_vm13 = vcmp.lt.s32.totalorder %v1360_v19, 0  ;;  %vm1414_vm11 = vmpackc.low %vm494_vm1, %vm1616_vm10  ;;  %vm1183_vm12 = vcmask 72704  }
 0x1a4   : > { %v761_v8 = vsel %vm1361_vm13, 0, %v1360_v19  ;;  %v1379_v59 = vclamps-f32 %v1155_v32, 10.0  ;;  %vm789_vm6 = vcmp.eq.s32.totalorder %v784_v4, 2  ;;  %vm786_vm7 = vcmp.eq.s32.totalorder %v784_v4, 0 }
 0x1a5   : > { %v762_v1 = vsub.s32 32, %v761_v8  ;;  %v766_v34 = vsub.s32 4294967266, %v761_v8  ;;  %v763_v63 = vshll.u32 %v754_v24, %v761_v8  ;;  %v1373_v24 = vclamps-f32 %v1067_v26, 10.0  ;;  %v1130_v8 = vpop.permute.xlu0 %1129 }
 0x1a6   : > { %v1525_v29 = vpop.eup %1524  ;;  %vm785_vm8 = vcmp.lt.s32.totalorder %v784_v4, 2  ;;  %v1161_v6 = vmax.f32 %v1379_v59, 0.0 }
 0x1a7   : > { %v764_v40 = vshrl.u32 %v746_v20, %v762_v1  ;;  %v767_v11 = vadd.s32 127, %v766_v34  ;;  %v1527_v49 = vpop.eup %1526  ;;  %v1117_v53 = vadd.f32 1.0, %v1525_v29  ;;  %v1170_v34 = vpop.permute.xlu1 %1169 }
 0x1a8   : > { %v1529_v31 = vpop.eup %1528  ;;  %v1032_v28 = vxor.u32 2147483648, %v1527_v49  ;;  %v1163_v20 = vmul.f32 %v1379_v59, %v1161_v6 }
 0x1a9   : > { %v765_v23 = vor.u32 %v764_v40, %v763_v63  ;;  %v768_v42 = vshll.u32 %v767_v11, 23  ;;  %v1029_v60 = vxor.u32 2147483648, %v1529_v31 }
 0x1aa   : > { %v1033_v16 = vsel %vm1031_vm3, %v1032_v28, %v1529_v31  ;;  %v1173_v63 = vmul.f32 %v1170_v34, %v1163_v20 }
 0x1ab   : > { %v769_v41 = vor.u32 4788187, %v768_v42  ;;  %v772_v35 = vcvt.s32.f32 %v765_v23  ;;  %v1030_v54 = vsel %vm1028_vm2, %v1527_v49, %v1029_v60 }
 0x1ac   : > { %v1034_v13 = vsel %vm1027_vm4, %v1030_v54, %v1033_v16 }
 0x1ad   : > { %v770_v27 = vand.u32 2147483647, %v769_v41  ;;  %v1035_v39 = vsel %vm1025_vm5, nan, %v1034_v13 }
 0x1ae   : > { %v1045_v3 = vmul.f32 %v2130_v2, %v1035_v39 }
 0x1af   : > { %v773_v58 = vmul.f32 %v772_v35, %v770_v27 }
 0x1b1   : > { %v774_v12 = vxor.u32 2147483648, %v773_v58 }
 0x1b3   : > { %v775_v17 = vsel %vm692_vm15, %v774_v12, %v773_v58 }
 0x1b4   : > { %v778_v44 = vsel %vm691_vm0, %v1802_v25, %v775_v17 }
 0x1b5   : > { %1530 = vcosq.f32 %v778_v44 }
 0x1b6   : > { %1532 = vsinq.f32 %v778_v44 }
 0x1b7   : > { %1534 = vrcp.f32 %v1117_v53 }
 0x1b8   : > { %1536 = vtanh.f32 %v1373_v24 }
 0x1bf   : > { %v1531_v57 = vpop.eup %1530 }
 0x1c0   : > { %v1533_v10 = vpop.eup %1532  ;;  %v790_v52 = vxor.u32 2147483648, %v1531_v57 }
 0x1c1   : > { %v787_v5 = vxor.u32 2147483648, %v1533_v10  ;;  %v1535_v47 = vpop.eup %1534 }
 0x1c2   : > { %v791_v37 = vsel %vm789_vm6, %v790_v52, %v1533_v10  ;;  %v1537_v19 = vpop.eup %1536  ;;  %v1123_v56 = vmul.f32 %v1535_v47, %v1375_v62 }
 0x1c3   : > { %v788_v38 = vsel %vm786_vm7, %v1531_v57, %v787_v5  ;;  %v1083_v9 = vmul.f32 %v1537_v19, %v2148_v43  ;;  %v1176_v43 = vld [vmem:[%s2270_s8] sm:$0xff] }
 0x1c4   : > { %v792_v7 = vsel %vm785_vm8, %v788_v38, %v791_v37  ;;  %v1133_v61 = vmul.f32 %v1130_v8, %v1123_v56 }
 0x1c5   : > { %v793_v21 = vsel %vm782_vm9, nan, %v792_v7 }
 0x1c6   : > { %v805_v15 = vmul.f32 %v2144_v18, %v793_v21 }
 0x1c8   : > { %v1047_v1 = vadd.f32 %v1045_v3, %v805_v15 }
 0x1ca   : > { %v1085_v2 = vadd.f32 %v1083_v9, %v1047_v1 }
 0x1cc   : > { %v1135_v25 = vadd.f32 %v1133_v61, %v1085_v2 }
 0x1ce   : > { %v1175_v40 = vadd.f32 %v1173_v63, %v1135_v25 }
 0x1d0   : > { %v1413_v18 = vpack.c.bf16 %v1175_v40, %v2165_v0 }
 0x1d1   : > { %v1181_v36 = vpop.permute.xlu0 %1180 }
 0x1d2   : > { %1415 = vmatpush3.bf16.msk.msra.mxu1 %vm1414_vm11, %v1413_v18 }
 0x1d5   : > { %1406 = vmatmul.mubr.msk.f32.vlgmr.msra.gmra.mrb[0].mxu1 %vm1183_vm12, %v1176_v43 }
 0x2a8   : > { %v1256_v62 = vpop.f32.mrb[0].mxu1 }
 0x2a9   : > { %v1257_v11 = vadd.f32 %v1256_v62, %v1181_v36  ;;  %v1407_v23 = vpop.f32.mrb[1].mxu1 }
 0x2ab   : > { %v1382_v42 = vclamps-f32 %v1257_v11, 100.0 }
 0x2ad   : > { %1262 = vst [vmem:[%s395_s28] sm:$0xff] %v1382_v42 }
 0x2ae   : > { %1551 = shalt.err (!%p1548_p5)
}
 0x2af   : > { %s1552_s12 = scalar_lea.hbm %s2218_s18, 128  ;;  %s1556_s30 = scalar_lea.hbm %s2272_s10, 256 }
 0x2b0   : > { %p1553_p7 = scmp.ne.s32.totalorder %s2218_s18, %s1552_s12  ;;  %p1557_p12 = scmp.lt.u32.totalorder %s2218_s18, %s2272_s10 }
 0x2b1   : > { %p1558_p13 = scmp.lt.u32.totalorder %s1556_s30, %s1552_s12  ;;  %p1560_p1 = scmp.lt.u32.totalorder %s1552_s12, %s2218_s18 }
 0x2b2   : > { %p1554_p10 = pnand %p1553_p7, %p1711_p6 }
 0x2b3   : > { %p1559_p0 = por %p1558_p13, %p1557_p12 }
 0x2b4   : > { %p1555_p11 = pneg %p1554_p10 }
 0x2b5   : > { %p1561_p2 = por %p1560_p1, %p1559_p0 }
 0x2b7   : > { %p1562_p3 = pnand %p1561_p2, %p1555_p11 }
 0x2b9   : > { %1565 = shalt.err (!%p1562_p3)
}
 0x2ba   : > { %1432 = dma.vmem_to_hbm [thread:$0]  (%p1711_p6), %s2220_s29, 128, %s2218_s18, %s1264_s20  }
 0x2bb PF: > { %s1289_s25 = sand.u32 1, %s1588_s13   ;;  %p1435_p4 = pnand %p1344_p9, %p1715_p8 }
 0x2bc   : > { %s1290_s26 = scalar_lea.sflag [#allocation4], %s1289_s25 }
 0x2bd   : > { %1583 = dma.done.wait (!%p1435_p4), %s1290_s26, 128  }
 0x2be   : > { %1585 = vsyncadd (!%p1435_p4), %s1290_s26, 4294967168  ;;  %p20_p5 = scmp.ge.s32.totalorder %s1696_s19, 4   ;;  %s2281_s13 = smov %s1592_s14 }
 0x2bf   : > { %s2282_s14 = smov %s1596_s15  ;;  %s2283_s15 = smov %s1709_s22 }
 0x2c0   : > { %s2284_s16 = smov %s1696_s19  ;;  %22 = sbr.rel (!%p20_p5) target bundleno = 3 (0x3), region = 138 }
 0x2c7   :  { %1295 = vsyncpa [#allocation4], 1 }
 0x2c8   :  { %1297 = vsyncpa [#allocation4 + $0x1], 1 }

</bundles_post_ra>
